<compile_context>
chip_gen: v5e
topology: v5e:2x2
jax: 0.10.0
libtpu: 0.0.40
codegen_flags: <defaults>
</compile_context>

<pallas_src>
import functools
import math

import jax
import jax.numpy as jnp
from jax.experimental import pallas as pl
from jax.experimental.pallas import tpu as pltpu


# ----------------------------------------------------------------------------
# Fused kernel: tiled embed matmul -> prototypes -> cdist -> softmax(-dist)
# ----------------------------------------------------------------------------
def _fused_proto_kernel(x_ref, w_ref, b_ref, avg_ref, out_ref, acc_ref, *,
                        n_support):
    # x_ref  : [M, tk]   bf16  concat(support, query) flattened, K-tile
    # w_ref  : [tk, D]   bf16  embedding weight, K-tile
    # b_ref  : [1, D]    f32   embedding bias
    # avg_ref: [n_way, Ns] f32 prototype-averaging matrix (1/n_shot pattern)
    # out_ref: [Nq, n_way]     softmax(-dist) logits
    # acc_ref: [M, D]    f32   VMEM-resident embedding accumulator
    k = pl.program_id(0)

    @pl.when(k == 0)
    def _():
        # Init with the broadcast bias: removes the [M, D] add from finalize.
        acc_ref[...] = jnp.broadcast_to(b_ref[...], acc_ref.shape)

    # bf16 MXU inputs, f32 accumulation.
    acc_ref[...] += jnp.dot(x_ref[...], w_ref[...],
                            preferred_element_type=jnp.float32)

    @pl.when(k == pl.num_programs(0) - 1)
    def _():
        emb = acc_ref[...]                              # [M, D] f32 (bias included)
        s_emb = emb[:n_support, :]                      # [Ns, D]
        q_emb = emb[n_support:, :]                      # [Nq, D]

        # Prototypes via a lane-aligned averaging matmul (MXU, f32).
        protos = jnp.dot(avg_ref[...], s_emb,
                         preferred_element_type=jnp.float32)   # [n_way, D]

        # ||q - p||_2 via  sqrt(||q||^2 + ||p||^2 - 2 q.p), all in f32.
        sq_q = jnp.sum(q_emb * q_emb, axis=1, keepdims=True)   # [Nq, 1]
        sq_p = jnp.sum(protos * protos, axis=1)[None, :]        # [1, n_way]
        cross = jax.lax.dot_general(
            q_emb, protos, (((1,), (1,)), ((), ())),
            preferred_element_type=jnp.float32)                 # [Nq, n_way]
        d2 = jnp.maximum(sq_q + sq_p - 2.0 * cross, 0.0)
        dist = jnp.sqrt(d2)

        # softmax(-dist, axis=1); exact divide (tiny tile, exact probabilities).
        neg = -dist
        mx = jnp.max(neg, axis=1, keepdims=True)
        e = jnp.exp(neg - mx)
        denom = jnp.sum(e, axis=1, keepdims=True)
        out_ref[...] = (e / denom).astype(out_ref.dtype)


# ----------------------------------------------------------------------------
# PrototypicalNetwork.forward
# ----------------------------------------------------------------------------
def prototypical_forward(support, queries, w, b):
    """support: [n_way, n_shot, C, H, W], queries: [n_way, n_query, C, H, W].

    Returns softmax(-cdist(embed(queries), prototypes)) of shape
    [n_way*n_query, n_way], matching the PyTorch module's forward().
    """
    n_way, n_shot = support.shape[0], support.shape[1]
    n_query = queries.shape[1]
    feat = math.prod(support.shape[2:])
    d = w.shape[1]

    ns = n_way * n_shot
    nq = n_way * n_query
    m = ns + nq

    # flatten(0, 1), flatten per-sample features (NCHW row-major), concat so
    # support+query share one embedding matmul; stream X and W as bf16.
    s_flat = support.reshape(ns, feat)
    q_flat = queries.reshape(nq, feat)
    x_all = jnp.concatenate([s_flat, q_flat], axis=0).astype(jnp.bfloat16)
    w_bf = w.astype(jnp.bfloat16)                              # [F, D] bf16
    b_f32 = b.astype(jnp.float32).reshape(1, d)

    # Averaging matrix: avg[i, j] = 1/n_shot for j in class-i's shot rows.
    avg = jnp.repeat(jnp.eye(n_way, dtype=jnp.float32), n_shot, axis=1) / n_shot

    # ---- K-tile selection -------------------------------------------------
    # Pad F up to a multiple of 128, then pick the largest tk (multiple of
    # 128, capped at 2048) whose double-buffered bf16 input tiles fit a
    # conservative VMEM budget that is safe on every TPU generation.
    feat_pad128 = ((feat + 127) // 128) * 128
    tile_budget = 24 << 20                    # bytes for double-buffered tiles

    def tile_bytes(t):
        # double-buffered bf16 W tile + double-buffered bf16 X tile
        return 2 * (t * d * 2) + 2 * (m * t * 2)

    tk = min(feat_pad128, 2048)
    while tk > 128 and tile_bytes(tk) > tile_budget:
        tk -= 128

    # Zero-pad F to a multiple of tk (zeros contribute nothing to the matmul).
    feat_pad = ((feat_pad128 + tk - 1) // tk) * tk
    if feat_pad != feat:
        x_all = jnp.pad(x_all, ((0, 0), (0, feat_pad - feat)))
        w_bf = jnp.pad(w_bf, ((0, feat_pad - feat), (0, 0)))
    grid = (feat_pad // tk,)

    # Explicit VMEM budget (tiles + accumulator + small resident blocks),
    # clamped to [32 MiB, 48 MiB] so it is legal on v5e/v6e (128 MiB physical)
    # and on v7x (64 MiB physical).
    need = (tile_bytes(tk) + m * d * 4 + d * 4
            + n_way * ns * 4 + nq * n_way * 4)
    vmem_limit = int(min(max(need + (8 << 20), 32 << 20), 48 << 20))

    cost = pl.CostEstimate(
        flops=2 * m * feat_pad * d + 2 * n_way * ns * d + 2 * nq * n_way * d,
        transcendentals=nq * n_way,
        bytes_accessed=(m * feat_pad + feat_pad * d) * 2 + d * 4
        + n_way * ns * 4 + nq * n_way * 4,
    )

    kernel = functools.partial(_fused_proto_kernel, n_support=ns)

    return pl.pallas_call(
        kernel,
        out_shape=jax.ShapeDtypeStruct((nq, n_way), jnp.float32),
        grid_spec=pltpu.PrefetchScalarGridSpec(
            num_scalar_prefetch=0,
            grid=grid,
            in_specs=[
                pl.BlockSpec((m, tk), lambda k: (0, k)),        # X tile (bf16)
                pl.BlockSpec((tk, d), lambda k: (k, 0)),        # W tile (bf16)
                pl.BlockSpec((1, d), lambda k: (0, 0)),         # bias (f32)
                pl.BlockSpec((n_way, ns), lambda k: (0, 0)),    # avg matrix
            ],
            out_specs=pl.BlockSpec((nq, n_way), lambda k: (0, 0)),
            scratch_shapes=[pltpu.VMEM((m, d), jnp.float32)],
        ),
        compiler_params=pltpu.CompilerParams(
            dimension_semantics=("arbitrary",),
            vmem_limit_bytes=vmem_limit),
        cost_estimate=cost,
    )(x_all, w_bf, b_f32, avg)


# ----------------------------------------------------------------------------
# pure-JAX reference (same bf16-in / f32-accumulate matmul numerics)
# ----------------------------------------------------------------------------
def reference_forward(support, queries, w, b):
    n_way, n_shot = support.shape[0], support.shape[1]
    n_query = queries.shape[1]
    feat = math.prod(support.shape[2:])
    wb = w.astype(jnp.bfloat16)
    s = jnp.dot(support.reshape(n_way * n_shot, feat).astype(jnp.bfloat16),
                wb, preferred_element_type=jnp.float32) + b
    q = jnp.dot(queries.reshape(n_way * n_query, feat).astype(jnp.bfloat16),
                wb, preferred_element_type=jnp.float32) + b
    protos = s.reshape(n_way, n_shot, -1).mean(axis=1)
    dist = jnp.sqrt(jnp.maximum(
        jnp.sum((q[:, None, :] - protos[None, :, :]) ** 2, axis=-1), 0.0))
    return jax.nn.softmax(-dist, axis=1)


if __name__ == "__main__":
    key = jax.random.PRNGKey(0)
    k1, k2, k3, k4 = jax.random.split(key, 4)

    n_way, n_shot, n_query = 4, 3, 5
    C, H, W = 4, 16, 16
    F = C * H * W          # 1024 -> single K-tile (grid collapses to (1,))
    D = 128                # embedding dim (embed_shape), lane-aligned

    support = jax.random.normal(k1, (n_way, n_shot, C, H, W), dtype=jnp.float32)
    queries = jax.random.normal(k2, (n_way, n_query, C, H, W), dtype=jnp.float32)

    # deterministic linear embedding parameters
    w = jax.random.normal(k3, (F, D), dtype=jnp.float32) / jnp.sqrt(F)
    b = 0.01 * jax.random.normal(k4, (1, D), dtype=jnp.float32)

    logits = prototypical_forward(support, queries, w, b)
    logits = jax.block_until_ready(logits)

    ref = reference_forward(support, queries, w, b)
    assert logits.shape == (n_way * n_query, n_way)
    # rows are exact probabilities (exact divide in the finalize step)
    assert jnp.allclose(jnp.sum(logits, axis=1), 1.0, atol=1e-5)
    # bf16 MXU path vs bf16 reference
    assert jnp.allclose(logits, ref, atol=2e-3, rtol=2e-2), "mismatch vs reference"

    print("KERNEL_OK")
</pallas_src>

<mosaic_0001>
module attributes {stable_mosaic.version = 11 : i64} {
  func.func @_fused_proto_kernel(%arg0: i32, %arg1: memref<32x1024xbf16, #tpu.memory_space<vmem>>, %arg2: memref<1024x128xbf16, #tpu.memory_space<vmem>>, %arg3: memref<1x128xf32, #tpu.memory_space<vmem>>, %arg4: memref<4x12xf32, #tpu.memory_space<vmem>>, %arg5: memref<20x4xf32, #tpu.memory_space<vmem>>, %arg6: memref<32x128xf32, #tpu.memory_space<vmem>>) attributes {dimension_semantics = [#tpu.dimension_semantics<arbitrary>], iteration_bounds = array<i64: 1>, scalar_prefetch = 0 : i64, scratch_operands = 1 : i64, tpu.core_type = #tpu.core_type<tc>, window_params = [{transform_indices = @transform_0, window_bounds = array<i64: 32, 1024>}, {transform_indices = @transform_1, window_bounds = array<i64: 1024, 128>}, {pipeline_mode = #tpu.pipeline_mode<synchronous>, transform_indices = @transform_2, window_bounds = array<i64: 1, 128>}, {pipeline_mode = #tpu.pipeline_mode<synchronous>, transform_indices = @transform_3, window_bounds = array<i64: 4, 12>}, {pipeline_mode = #tpu.pipeline_mode<synchronous>, transform_indices = @transform_4, window_bounds = array<i64: 20, 4>}]} {
    %c0_i32 = arith.constant 0 : i32
    %0 = arith.cmpi eq, %arg0, %c0_i32 : i32
    %1 = arith.extui %0 : i1 to i32
    %c0_i32_0 = arith.constant 0 : i32
    %2 = arith.cmpi ne, %1, %c0_i32_0 : i32
    scf.if %2 {
      %c0_10 = arith.constant 0 : index
      %c0_11 = arith.constant 0 : index
      %12 = vector.load %arg3[%c0_10, %c0_11] : memref<1x128xf32, #tpu.memory_space<vmem>>, vector<1x128xf32>
      %13 = vector.shape_cast %12 : vector<1x128xf32> to vector<1x128xf32>
      %14 = vector.broadcast %13 : vector<1x128xf32> to vector<32x128xf32>
      %c0_12 = arith.constant 0 : index
      %c0_13 = arith.constant 0 : index
      %15 = vector.load %arg6[%c0_12, %c0_13] : memref<32x128xf32, #tpu.memory_space<vmem>>, vector<32x128xf32>
      tpu.vector_store %arg6[%c0_12, %c0_13], %14 {strides = array<i32>} : memref<32x128xf32, #tpu.memory_space<vmem>>, vector<32x128xf32>,
    } else {
    }
    %c0 = arith.constant 0 : index
    %c0_1 = arith.constant 0 : index
    %3 = vector.load %arg6[%c0, %c0_1] : memref<32x128xf32, #tpu.memory_space<vmem>>, vector<32x128xf32>
    %c0_2 = arith.constant 0 : index
    %c0_3 = arith.constant 0 : index
    %4 = vector.load %arg1[%c0_2, %c0_3] : memref<32x1024xbf16, #tpu.memory_space<vmem>>, vector<32x1024xbf16>
    %c0_4 = arith.constant 0 : index
    %c0_5 = arith.constant 0 : index
    %5 = vector.load %arg2[%c0_4, %c0_5] : memref<1024x128xbf16, #tpu.memory_space<vmem>>, vector<1024x128xbf16>
    %cst = arith.constant dense<0.000000e+00> : vector<32x128xf32>
    %6 = tpu.matmul %4, %5, %cst {dimension_numbers = #tpu.dot_dimension_numbers<[1], [0], [0], [1], [0, 0, 1, 1], [], []>} : vector<32x1024xbf16>, vector<1024x128xbf16>, vector<32x128xf32> -> vector<32x128xf32>
    %7 = arith.addf %3, %6 : vector<32x128xf32>
    %c0_6 = arith.constant 0 : index
    %c0_7 = arith.constant 0 : index
    %8 = vector.load %arg6[%c0_6, %c0_7] : memref<32x128xf32, #tpu.memory_space<vmem>>, vector<32x128xf32>
    tpu.vector_store %arg6[%c0_6, %c0_7], %7 {strides = array<i32>} : memref<32x128xf32, #tpu.memory_space<vmem>>, vector<32x128xf32>,
    %c0_i32_8 = arith.constant 0 : i32
    %9 = arith.cmpi eq, %arg0, %c0_i32_8 : i32
    %10 = arith.extui %9 : i1 to i32
    %c0_i32_9 = arith.constant 0 : i32
    %11 = arith.cmpi ne, %10, %c0_i32_9 : i32
    scf.if %11 {
      %c0_10 = arith.constant 0 : index
      %c0_11 = arith.constant 0 : index
      %12 = vector.load %arg6[%c0_10, %c0_11] : memref<32x128xf32, #tpu.memory_space<vmem>>, vector<32x128xf32>
      %13 = vector.extract_strided_slice %12 {offsets = [0, 0], sizes = [12, 128], strides = [1, 1]} : vector<32x128xf32> to vector<12x128xf32>
      %14 = vector.extract_strided_slice %12 {offsets = [12, 0], sizes = [20, 128], strides = [1, 1]} : vector<32x128xf32> to vector<20x128xf32>
      %c0_12 = arith.constant 0 : index
      %c0_13 = arith.constant 0 : index
      %15 = vector.load %arg4[%c0_12, %c0_13] : memref<4x12xf32, #tpu.memory_space<vmem>>, vector<4x12xf32>
      %cst_14 = arith.constant dense<0.000000e+00> : vector<4x128xf32>
      %16 = tpu.matmul %15, %13, %cst_14 {dimension_numbers = #tpu.dot_dimension_numbers<[1], [0], [0], [1], [0, 0, 1, 1], [], []>} : vector<4x12xf32>, vector<12x128xf32>, vector<4x128xf32> -> vector<4x128xf32>
      %17 = arith.mulf %14, %14 : vector<20x128xf32>
      %cst_15 = arith.constant dense<0.000000e+00> : vector<20xf32>
      %18 = vector.multi_reduction <add>, %17, %cst_15 [1] : vector<20x128xf32> to vector<20xf32>
      %19 = vector.shape_cast %18 : vector<20xf32> to vector<20x1xf32>
      %20 = arith.mulf %16, %16 : vector<4x128xf32>
      %cst_16 = arith.constant dense<0.000000e+00> : vector<4xf32>
      %21 = vector.multi_reduction <add>, %20, %cst_16 [1] : vector<4x128xf32> to vector<4xf32>
      %22 = vector.shape_cast %21 : vector<4xf32> to vector<1x4xf32>
      %cst_17 = arith.constant dense<0.000000e+00> : vector<20x4xf32>
      %23 = tpu.matmul %14, %16, %cst_17 {dimension_numbers = #tpu.dot_dimension_numbers<[1], [1], [0], [0], [0, 0, 1, 0], [], []>} : vector<20x128xf32>, vector<4x128xf32>, vector<20x4xf32> -> vector<20x4xf32>
      %24 = vector.broadcast %19 : vector<20x1xf32> to vector<20x4xf32>
      %25 = vector.broadcast %22 : vector<1x4xf32> to vector<20x4xf32>
      %26 = arith.addf %24, %25 : vector<20x4xf32>
      %cst_18 = arith.constant 2.000000e+00 : f32
      %27 = vector.broadcast %cst_18 : f32 to vector<20x4xf32>
      %28 = arith.mulf %27, %23 : vector<20x4xf32>
      %29 = arith.subf %26, %28 : vector<20x4xf32>
      %cst_19 = arith.constant 0.000000e+00 : f32
      %30 = vector.broadcast %cst_19 : f32 to vector<20x4xf32>
      %31 = arith.maximumf %29, %30 : vector<20x4xf32>
      %32 = math.sqrt %31 : vector<20x4xf32>
      %cst_20 = arith.constant 0.000000e+00 : f32
      %33 = vector.broadcast %cst_20 : f32 to vector<20x4xf32>
      %34 = arith.subf %33, %32 : vector<20x4xf32>
      %cst_21 = arith.constant dense<0xFF800000> : vector<20xf32>
      %35 = vector.multi_reduction <maximumf>, %34, %cst_21 [1] : vector<20x4xf32> to vector<20xf32>
      %36 = vector.shape_cast %35 : vector<20xf32> to vector<20x1xf32>
      %37 = vector.broadcast %36 : vector<20x1xf32> to vector<20x4xf32>
      %38 = arith.subf %34, %37 : vector<20x4xf32>
      %39 = math.exp %38 : vector<20x4xf32>
      %cst_22 = arith.constant dense<0.000000e+00> : vector<20xf32>
      %40 = vector.multi_reduction <add>, %39, %cst_22 [1] : vector<20x4xf32> to vector<20xf32>
      %41 = vector.shape_cast %40 : vector<20xf32> to vector<20x1xf32>
      %42 = vector.broadcast %41 : vector<20x1xf32> to vector<20x4xf32>
      %43 = arith.divf %39, %42 : vector<20x4xf32>
      %c0_23 = arith.constant 0 : index
      %c0_24 = arith.constant 0 : index
      %44 = vector.load %arg5[%c0_23, %c0_24] : memref<20x4xf32, #tpu.memory_space<vmem>>, vector<20x4xf32>
      tpu.vector_store %arg5[%c0_23, %c0_24], %43 {strides = array<i32>} : memref<20x4xf32, #tpu.memory_space<vmem>>, vector<20x4xf32>,
    } else {
    }
    return
  }
  func.func @transform_0(%arg0: i32) -> (i32, i32) {
    %c0_i32 = arith.constant 0 : i32
    %c0_i32_0 = arith.constant 0 : i32
    return %c0_i32, %arg0 : i32, i32
  }
  func.func @transform_1(%arg0: i32) -> (i32, i32) {
    %c0_i32 = arith.constant 0 : i32
    %c0_i32_0 = arith.constant 0 : i32
    return %arg0, %c0_i32 : i32, i32
  }
  func.func @transform_2(%arg0: i32) -> (i32, i32) {
    %c0_i32 = arith.constant 0 : i32
    %c0_i32_0 = arith.constant 0 : i32
    %c0_i32_1 = arith.constant 0 : i32
    return %c0_i32, %c0_i32_0 : i32, i32
  }
  func.func @transform_3(%arg0: i32) -> (i32, i32) {
    %c0_i32 = arith.constant 0 : i32
    %c0_i32_0 = arith.constant 0 : i32
    %c0_i32_1 = arith.constant 0 : i32
    return %c0_i32, %c0_i32_0 : i32, i32
  }
  func.func @transform_4(%arg0: i32) -> (i32, i32) {
    %c0_i32 = arith.constant 0 : i32
    %c0_i32_0 = arith.constant 0 : i32
    %c0_i32_1 = arith.constant 0 : i32
    return %c0_i32, %c0_i32_0 : i32, i32
  }
}

</mosaic_0001>

<bundles_post_ra>
// kernel: tpu_custom_call.1
= control target key start
LH: loop header
LB: loop body
LE: loop exit
PB: predicated region body
PF: predicated region fallthrough
CT: control target
= control target key end

     0   :  { %9 = vsyncpa [#allocation4], 0  ;;  %s1672_s0 = inlined_call_operand.hbm [shape: bf16[32,1024], index: 0, kind: input, shape index: {}]   ;;  %s1673_s1 = inlined_call_operand.hbm [shape: bf16[1024,128], index: 1, kind: input, shape index: {}]   ;;  %s1674_s2 = inlined_call_operand.vmem [shape: f32[1,128], index: 2, kind: input, shape index: {}]   ;;  %s1675_s3 = inlined_call_operand.hbm [shape: f32[4,12], index: 3, kind: input, shape index: {}]   ;;  %s1676_s4 = inlined_call_operand.vmem [shape: f32[20,4], index: 4, kind: output, shape index: {}]  }
   0x1   :  { %10 = vsyncpa [#allocation6], 0  ;;  %s28_s17 = sshll.u32 %s1673_s1, 4  ;;  %s1604_s18 = smov [#allocation5]   ;;  %s29_s17 = int_to_ptr.hbm [resolvable:$true] %s28_s17 }
   0x2   :  { %s30_s19 = sshll.u32 %s1604_s18, 4  ;;  %s15_s22 = sshll.u32 %s1672_s0, 4  ;;  %s31_s19 = int_to_ptr.vmem [resolvable:$true] %s30_s19  ;;  %s16_s22 = int_to_ptr.hbm [resolvable:$true] %s15_s22 }
   0x3   :  { %s1605_s23 = smov 64   ;;  %s1606_s24 = smov 4  }
   0x4   :  { %36 = dma.hbm_to_vmem [thread:$0]  %s29_s17, 8192, %s31_s19, [#allocation6], %s1605_s23, %s1605_s23, %s1606_s24  }
   0x5   :  { %s1607_s25 = smov [#allocation3]   ;;  %s1608_s27 = smov 512  }
   0x6   :  { %s17_s26 = sshll.u32 %s1607_s25, 4  ;;  %s1609_s28 = smov 32   ;;  %s18_s26 = int_to_ptr.vmem [resolvable:$true] %s17_s26 }
   0x7   :  { %23 = dma.hbm_to_vmem [thread:$0]  %s16_s22, 2048, %s18_s26, [#allocation4], %s1608_s27, %s1608_s27, %s1609_s28  }
   0x8   :  { %s44_s30 = sshll.u32 %s1675_s3, 4  ;;  %s1610_s5 = smov [#allocation7]   ;;  %s45_s30 = int_to_ptr.hbm [resolvable:$true] %s44_s30 }
   0x9   :  { %s46_s6 = sshll.u32 %s1610_s5, 4  ;;  %s47_s6 = int_to_ptr.vmem [resolvable:$true] %s46_s6 }
   0xa   :  { %49 = dma.hbm_to_vmem [thread:$0]  %s45_s30, 64, %s47_s6, [#allocation6]  }
   0xb   :  { %1600 = dma.done.wait [#allocation4], 2048  }
   0xc   :  { %1601 = vsyncadd [#allocation4], 4294965248 }
   0xd   :  { %1602 = dma.done.wait [#allocation6], 8256  }
   0xe   :  { %1603 = vsyncadd [#allocation6], 4294959040  ;;  %v1443_v0 = vld [vmem:[#allocation5 + $0x38] sm:$0xff]  ;;  %v1442_v4 = vld [vmem:[#allocation5 + $0x30] sm:$0xff]  ;;  %vm858_vm0 = vcmask 1043456   ;;  %vm854_vm1 = vcmask 97280  }
   0xf   :  { %v1451_v1 = vld [vmem:[#allocation5 + $0x78] sm:$0xff]  ;;  %686 = vmatpush.bf16.msra.mxu0 %v1443_v0  ;;  %v1450_v5 = vld [vmem:[#allocation5 + $0x70] sm:$0xff]  ;;  %v1441_v8 = vld [vmem:[#allocation5 + $0x28] sm:$0xff]  ;;  %vm885_vm2 = vcmask 1047556   ;;  %vm1015_vm5 = vcmask 31748   ;;  %vm1019_vm10 = vcmask 31744  }
  0x10   :  { %v1459_v2 = vld [vmem:[#allocation5 + $0xb8] sm:$0xff]  ;;  %705 = vmatpush.bf16.msra.mxu1 %v1451_v1  ;;  %v1458_v6 = vld [vmem:[#allocation5 + $0xb0] sm:$0xff]  ;;  %v1449_v9 = vld [vmem:[#allocation5 + $0x68] sm:$0xff] }
  0x11   :  { %v1467_v3 = vld [vmem:[#allocation5 + $0xf8] sm:$0xff]  ;;  %724 = vmatpush.bf16.msra.mxu2 %v1459_v2  ;;  %v1466_v7 = vld [vmem:[#allocation5 + $0xf0] sm:$0xff]  ;;  %v1457_v10 = vld [vmem:[#allocation5 + $0xa8] sm:$0xff] }
  0x12   :  { %743 = vmatpush.bf16.msra.mxu3 %v1467_v3  ;;  %v1465_v11 = vld [vmem:[#allocation5 + $0xe8] sm:$0xff]  ;;  %v1440_v12 = vld [vmem:[#allocation5 + $0x20] sm:$0xff]  ;;  %v1439_v16 = vld [vmem:[#allocation5 + $0x18] sm:$0xff] }
  0x13   :  { %687 = vmatpush.bf16.msra.mxu0 %v1442_v4  ;;  %v1448_v13 = vld [vmem:[#allocation5 + $0x60] sm:$0xff]  ;;  %v1447_v17 = vld [vmem:[#allocation5 + $0x58] sm:$0xff]  ;;  %v1438_v20 = vld [vmem:[#allocation5 + $0x10] sm:$0xff] }
  0x14   :  { %706 = vmatpush.bf16.msra.mxu1 %v1450_v5  ;;  %v1456_v14 = vld [vmem:[#allocation5 + $0xa0] sm:$0xff]  ;;  %v1455_v18 = vld [vmem:[#allocation5 + $0x98] sm:$0xff]  ;;  %v1446_v21 = vld [vmem:[#allocation5 + $0x50] sm:$0xff] }
  0x15   :  { %725 = vmatpush.bf16.msra.mxu2 %v1458_v6  ;;  %v1464_v15 = vld [vmem:[#allocation5 + $0xe0] sm:$0xff]  ;;  %v1463_v19 = vld [vmem:[#allocation5 + $0xd8] sm:$0xff]  ;;  %v1454_v22 = vld [vmem:[#allocation5 + $0x90] sm:$0xff] }
  0x16   :  { %744 = vmatpush.bf16.msra.mxu3 %v1466_v7  ;;  %v1462_v23 = vld [vmem:[#allocation5 + $0xd0] sm:$0xff]  ;;  %v1437_v24 = vld [vmem:[#allocation5 + $0x8] sm:$0xff]  ;;  %v1436_v28 = vld [vmem:[#allocation5] sm:$0xff] }
  0x17   :  { %688 = vmatpush.bf16.msra.mxu0 %v1441_v8  ;;  %v1445_v25 = vld [vmem:[#allocation5 + $0x48] sm:$0xff]  ;;  %v1444_v29 = vld [vmem:[#allocation5 + $0x40] sm:$0xff]  ;;  %v1475_v40 = vld [vmem:[#allocation5 + $0x138] sm:$0xff] }
  0x18   :  { %707 = vmatpush.bf16.msra.mxu1 %v1449_v9  ;;  %v1453_v26 = vld [vmem:[#allocation5 + $0x88] sm:$0xff]  ;;  %v1452_v30 = vld [vmem:[#allocation5 + $0x80] sm:$0xff]  ;;  %v1483_v41 = vld [vmem:[#allocation5 + $0x178] sm:$0xff] }
  0x19   :  { %726 = vmatpush.bf16.msra.mxu2 %v1457_v10  ;;  %v1461_v27 = vld [vmem:[#allocation5 + $0xc8] sm:$0xff]  ;;  %v1460_v31 = vld [vmem:[#allocation5 + $0xc0] sm:$0xff]  ;;  %v1491_v46 = vld [vmem:[#allocation5 + $0x1b8] sm:$0xff] }
  0x1a   :  { %745 = vmatpush.bf16.msra.mxu3 %v1465_v11  ;;  %v1100_v32 = vld [vmem:[#allocation3] sm:$0xf]  ;;  %v1420_v34 = vld [vmem:[#allocation3 + $0x4] sm:$0xf]  ;;  %v1108_v36 = vld [vmem:[#allocation3 + $0x8] sm:$0xf] }
  0x1b   :  { %689 = vmatpush.bf16.msra.mxu0 %v1440_v12  ;;  %v1424_v33 = vld [vmem:[#allocation3 + $0x1c] sm:$0xf0]  ;;  %v1102_v35 = vld [vmem:[#allocation3 + $0x20] sm:$0xf0]  ;;  %v1425_v37 = vld [vmem:[#allocation3 + $0x24] sm:$0xf0] }
  0x1c   :  { %708 = vmatpush.bf16.msra.mxu1 %v1448_v13  ;;  %v1421_v38 = vld [vmem:[#allocation3 + $0xc] sm:$0xf]  ;;  %v1101_v42 = vor.u32 %v1424_v33, %v1100_v32  ;;  %v1105_v43 = vor.u32 %v1420_v34, %v1102_v35  ;;  %v1109_v44 = vor.u32 %v1425_v37, %v1108_v36  ;;  %v1499_v47 = vld [vmem:[#allocation5 + $0x1f8] sm:$0xff]  ;;  %v1474_v48 = vld [vmem:[#allocation5 + $0x130] sm:$0xff] }
  0x1d   :  { %727 = vmatpush.bf16.msra.mxu2 %v1456_v14  ;;  %v1110_v39 = vld [vmem:[#allocation3 + $0x28] sm:$0xf0]  ;;  %v1482_v49 = vld [vmem:[#allocation5 + $0x170] sm:$0xff]  ;;  %v1472_v56 = vld [vmem:[#allocation5 + $0x120] sm:$0xff] }
  0x1e   :  { %746 = vmatpush.bf16.msra.mxu3 %v1464_v15  ;;  %v1113_v45 = vor.u32 %v1421_v38, %v1110_v39  ;;  %v1490_v50 = vld [vmem:[#allocation5 + $0x1b0] sm:$0xff]  ;;  %v1473_v52 = vld [vmem:[#allocation5 + $0x128] sm:$0xff]  ;;  %v1480_v57 = vld [vmem:[#allocation5 + $0x160] sm:$0xff] }
  0x1f   :  { %690 = vmatpush.bf16.msra.mxu0 %v1439_v16  ;;  %v1498_v51 = vld [vmem:[#allocation5 + $0x1f0] sm:$0xff]  ;;  %v1481_v53 = vld [vmem:[#allocation5 + $0x168] sm:$0xff]  ;;  %v1488_v58 = vld [vmem:[#allocation5 + $0x1a0] sm:$0xff] }
  0x20   :  { %709 = vmatpush.bf16.msra.mxu1 %v1447_v17  ;;  %v1489_v54 = vld [vmem:[#allocation5 + $0x1a8] sm:$0xff]  ;;  %v1496_v59 = vld [vmem:[#allocation5 + $0x1e0] sm:$0xff]  ;;  %v1471_v4 = vld [vmem:[#allocation5 + $0x118] sm:$0xff] }
  0x21   :  { %728 = vmatpush.bf16.msra.mxu2 %v1455_v18  ;;  %v1497_v55 = vld [vmem:[#allocation5 + $0x1e8] sm:$0xff]  ;;  %v1132_v60 = vld [vmem:[#allocation3 + $0x40] sm:$0xf]  ;;  %v1428_v62 = vld [vmem:[#allocation3 + $0x44] sm:$0xf] }
  0x22   :  { %747 = vmatpush.bf16.msra.mxu3 %v1463_v19  ;;  %v1432_v61 = vld [vmem:[#allocation3 + $0x5c] sm:$0xf0]  ;;  %v1134_v63 = vld [vmem:[#allocation3 + $0x60] sm:$0xf0]  ;;  %v1140_v0 = vld [vmem:[#allocation3 + $0x48] sm:$0xf] }
  0x23   :  { %691 = vmatpush.bf16.msra.mxu0 %v1438_v20  ;;  %v1433_v1 = vld [vmem:[#allocation3 + $0x64] sm:$0xf0]  ;;  %v1429_v2 = vld [vmem:[#allocation3 + $0x4c] sm:$0xf]  ;;  %v1479_v5 = vld [vmem:[#allocation5 + $0x158] sm:$0xff]  ;;  %v1133_v6 = vor.u32 %v1432_v61, %v1132_v60  ;;  %v1137_v7 = vor.u32 %v1428_v62, %v1134_v63 }
  0x24   :  { %710 = vmatpush.bf16.msra.mxu1 %v1446_v21  ;;  %v1142_v3 = vld [vmem:[#allocation3 + $0x68] sm:$0xf0]  ;;  %v1141_v8 = vor.u32 %v1433_v1, %v1140_v0  ;;  %v1487_v10 = vld [vmem:[#allocation5 + $0x198] sm:$0xff]  ;;  %v1470_v12 = vld [vmem:[#allocation5 + $0x110] sm:$0xff] }
  0x25   :  { %729 = vmatpush.bf16.msra.mxu2 %v1454_v22  ;;  %v1145_v9 = vor.u32 %v1429_v2, %v1142_v3  ;;  %v1495_v11 = vld [vmem:[#allocation5 + $0x1d8] sm:$0xff]  ;;  %v1478_v13 = vld [vmem:[#allocation5 + $0x150] sm:$0xff]  ;;  %v1469_v16 = vld [vmem:[#allocation5 + $0x108] sm:$0xff] }
  0x26   :  { %748 = vmatpush.bf16.msra.mxu3 %v1462_v23  ;;  %v1486_v14 = vld [vmem:[#allocation5 + $0x190] sm:$0xff]  ;;  %v1477_v17 = vld [vmem:[#allocation5 + $0x148] sm:$0xff]  ;;  %v1468_v20 = vld [vmem:[#allocation5 + $0x100] sm:$0xff] }
  0x27   :  { %692 = vmatpush.bf16.msra.mxu0 %v1437_v24  ;;  %v1494_v15 = vld [vmem:[#allocation5 + $0x1d0] sm:$0xff]  ;;  %v1485_v18 = vld [vmem:[#allocation5 + $0x188] sm:$0xff]  ;;  %v1476_v21 = vld [vmem:[#allocation5 + $0x140] sm:$0xff] }
  0x28   :  { %711 = vmatpush.bf16.msra.mxu1 %v1445_v25  ;;  %v1493_v19 = vld [vmem:[#allocation5 + $0x1c8] sm:$0xff]  ;;  %v1484_v22 = vld [vmem:[#allocation5 + $0x180] sm:$0xff]  ;;  %v1116_v24 = vld [vmem:[#allocation3 + $0x10] sm:$0xf] }
  0x29   :  { %730 = vmatpush.bf16.msra.mxu2 %v1453_v26  ;;  %v1492_v23 = vld [vmem:[#allocation5 + $0x1c0] sm:$0xff]  ;;  %v1426_v25 = vld [vmem:[#allocation3 + $0x2c] sm:$0xf0]  ;;  %v1422_v26 = vld [vmem:[#allocation3 + $0x14] sm:$0xf] }
  0x2a   :  { %749 = vmatpush.bf16.msra.mxu3 %v1461_v27  ;;  %v1118_v27 = vld [vmem:[#allocation3 + $0x30] sm:$0xf0]  ;;  %v1117_v32 = vor.u32 %v1426_v25, %v1116_v24  ;;  %v1148_v36 = vld [vmem:[#allocation3 + $0x50] sm:$0xf]  ;;  %v1156_v38 = vld [vmem:[#allocation3 + $0x58] sm:$0xf] }
  0x2b   :  { %693 = vmatpush.bf16.msra.mxu0 %v1436_v28  ;;  %v1124_v28 = vld [vmem:[#allocation3 + $0x18] sm:$0xf]  ;;  %v1121_v33 = vor.u32 %v1422_v26, %v1118_v27  ;;  %v1434_v37 = vld [vmem:[#allocation3 + $0x6c] sm:$0xf0]  ;;  %v1430_v39 = vld [vmem:[#allocation3 + $0x54] sm:$0xf] }
  0x2c   :  { %712 = vmatpush.bf16.msra.mxu1 %v1444_v29  ;;  %v1427_v29 = vld [vmem:[#allocation3 + $0x34] sm:$0xf0]  ;;  %v1509_v26 = vld [vmem:[%s1674_s2] ss:$0 sm:$0xff] }
  0x2d   :  { %731 = vmatpush.bf16.msra.mxu2 %v1452_v30  ;;  %v1423_v30 = vld [vmem:[#allocation3 + $0x1c] sm:$0xf]  ;;  %v1125_v34 = vor.u32 %v1427_v29, %v1124_v28 }
  0x2e   :  { %750 = vmatpush.bf16.msra.mxu3 %v1460_v31  ;;  %694 = vmatmul.bf16.vlgmr.msra.gmra.mxu0 %v1101_v42  ;;  %v1126_v31 = vld [vmem:[#allocation3 + $0x38] sm:$0xf0] }
  0x2f   :  { %762 = vmatpush.bf16.msrb.mxu0 %v1475_v40  ;;  %713 = vmatmul.bf16.vlgmr.msra.gmra.mxu1 %v1105_v43  ;;  %v1129_v35 = vor.u32 %v1423_v30, %v1126_v31  ;;  %v1150_v40 = vld [vmem:[#allocation3 + $0x70] sm:$0xf0]  ;;  %v1431_v42 = vld [vmem:[#allocation3 + $0x5c] sm:$0xf] }
  0x30   :  { %781 = vmatpush.bf16.msrb.mxu1 %v1483_v41  ;;  %732 = vmatmul.bf16.vlgmr.msra.gmra.mxu2 %v1109_v44  ;;  %v1435_v41 = vld [vmem:[#allocation3 + $0x74] sm:$0xf0]  ;;  %v1158_v43 = vld [vmem:[#allocation3 + $0x78] sm:$0xf0]  ;;  %v1149_v44 = vor.u32 %v1434_v37, %v1148_v36 }
  0x31   :  { %751 = vmatmul.bf16.vlgmr.msra.gmra.mxu3 %v1113_v45  ;;  %800 = vmatpush.bf16.msrb.mxu2 %v1491_v46  ;;  %v1153_v45 = vor.u32 %v1430_v39, %v1150_v40  ;;  %v1157_v46 = vor.u32 %v1435_v41, %v1156_v38 }
  0x32   :  { %819 = vmatpush.bf16.msrb.mxu3 %v1499_v47  ;;  %v1161_v47 = vor.u32 %v1431_v42, %v1158_v43 }
  0x33   :  { %763 = vmatpush.bf16.msrb.mxu0 %v1474_v48 }
  0x34   :  { %782 = vmatpush.bf16.msrb.mxu1 %v1482_v49 }
  0x35   :  { %801 = vmatpush.bf16.msrb.mxu2 %v1490_v50 }
  0x36   :  { %820 = vmatpush.bf16.msrb.mxu3 %v1498_v51 }
  0x37   :  { %764 = vmatpush.bf16.msrb.mxu0 %v1473_v52 }
  0x38   :  { %783 = vmatpush.bf16.msrb.mxu1 %v1481_v53 }
  0x39   :  { %802 = vmatpush.bf16.msrb.mxu2 %v1489_v54 }
  0x3a   :  { %821 = vmatpush.bf16.msrb.mxu3 %v1497_v55 }
  0x3b   :  { %765 = vmatpush.bf16.msrb.mxu0 %v1472_v56 }
  0x3c   :  { %784 = vmatpush.bf16.msrb.mxu1 %v1480_v57 }
  0x3d   :  { %803 = vmatpush.bf16.msrb.mxu2 %v1488_v58 }
  0x3e   :  { %822 = vmatpush.bf16.msrb.mxu3 %v1496_v59  ;;  %699 = vmatmul.bf16.gmra.mxu0 %v1133_v6 }
  0x3f   :  { %766 = vmatpush.bf16.msrb.mxu0 %v1471_v4  ;;  %718 = vmatmul.bf16.gmra.mxu1 %v1137_v7 }
  0x40   :  { %785 = vmatpush.bf16.msrb.mxu1 %v1479_v5  ;;  %737 = vmatmul.bf16.gmra.mxu2 %v1141_v8 }
  0x41   :  { %756 = vmatmul.bf16.gmra.mxu3 %v1145_v9  ;;  %804 = vmatpush.bf16.msrb.mxu2 %v1487_v10 }
  0x42   :  { %823 = vmatpush.bf16.msrb.mxu3 %v1495_v11 }
  0x43   :  { %767 = vmatpush.bf16.msrb.mxu0 %v1470_v12 }
  0x44   :  { %786 = vmatpush.bf16.msrb.mxu1 %v1478_v13 }
  0x45   :  { %805 = vmatpush.bf16.msrb.mxu2 %v1486_v14 }
  0x46   :  { %824 = vmatpush.bf16.msrb.mxu3 %v1494_v15 }
  0x47   :  { %768 = vmatpush.bf16.msrb.mxu0 %v1469_v16 }
  0x48   :  { %787 = vmatpush.bf16.msrb.mxu1 %v1477_v17 }
  0x49   :  { %806 = vmatpush.bf16.msrb.mxu2 %v1485_v18 }
  0x4a   :  { %825 = vmatpush.bf16.msrb.mxu3 %v1493_v19 }
  0x4b   :  { %769 = vmatpush.bf16.msrb.mxu0 %v1468_v20 }
  0x4c   :  { %788 = vmatpush.bf16.msrb.mxu1 %v1476_v21 }
  0x4d   :  { %807 = vmatpush.bf16.msrb.mxu2 %v1484_v22 }
  0x4e   :  { %826 = vmatpush.bf16.msrb.mxu3 %v1492_v23  ;;  %770 = vmatmul.bf16.vlgmr.msrb.gmra.mxu0 %v1117_v32 }
  0x4f   :  { %789 = vmatmul.bf16.vlgmr.msrb.gmra.mxu1 %v1121_v33 }
  0x50   :  { %808 = vmatmul.bf16.vlgmr.msrb.gmra.mxu2 %v1125_v34  ;;  %v853_v34 = vld [vmem:[#allocation7] sm:$0xf] }
  0x51   :  { %827 = vmatmul.bf16.vlgmr.msrb.gmra.mxu3 %v1129_v35 }
  0x5e   :  { %775 = vmatmul.bf16.gmra.mxu0 %v1149_v44 }
  0x5f   :  { %794 = vmatmul.bf16.gmra.mxu1 %v1153_v45 }
  0x60   :  { %813 = vmatmul.bf16.gmra.mxu2 %v1157_v46 }
  0x61   :  { %832 = vmatmul.bf16.gmra.mxu3 %v1161_v47 }
  0xab   :  { %v695_v48 = vpop.f32.mrf.mxu0 }
  0xac   :  { %v714_v49 = vpop.f32.mrf.mxu1 }
  0xad   :  { %v715_v0 = vadd.f32 %v714_v49, %v695_v48 }
  0xb3   :  { %v733_v50 = vpop.f32.mrf.mxu2  ;;  %v697_v52 = vpop.f32.mrf.mxu0 }
  0xb4   :  { %v752_v51 = vpop.f32.mrf.mxu3  ;;  %v716_v53 = vpop.f32.mrf.mxu1  ;;  %v734_v3 = vadd.f32 %v733_v50, %v715_v0 }
  0xb5   :  { %v717_v4 = vadd.f32 %v716_v53, %v697_v52 }
  0xb6   :  { %v753_v6 = vadd.f32 %v752_v51, %v734_v3 }
  0xbb   :  { %v735_v54 = vpop.f32.mrf.mxu2  ;;  %v700_v56 = vpop.f32.mrf.mxu0 }
  0xbc   :  { %v754_v55 = vpop.f32.mrf.mxu3  ;;  %v719_v57 = vpop.f32.mrf.mxu1  ;;  %v736_v5 = vadd.f32 %v735_v54, %v717_v4 }
  0xbd   :  { %v720_v13 = vadd.f32 %v719_v57, %v700_v56 }
  0xbe   :  { %v755_v9 = vadd.f32 %v754_v55, %v736_v5 }
  0xc3   :  { %v738_v58 = vpop.f32.mrf.mxu2  ;;  %v702_v60 = vpop.f32.mrf.mxu0 }
  0xc4   :  { %v757_v59 = vpop.f32.mrf.mxu3  ;;  %v721_v61 = vpop.f32.mrf.mxu1  ;;  %v739_v15 = vadd.f32 %v738_v58, %v720_v13 }
  0xc5   :  { %v722_v25 = vadd.f32 %v721_v61, %v702_v60 }
  0xc6   :  { %v758_v21 = vadd.f32 %v757_v59, %v739_v15 }
  0xcb   :  { %v740_v62 = vpop.f32.mrf.mxu2  ;;  %v771_v1 = vpop.f32.mrf.mxu0 }
  0xcc   :  { %v759_v63 = vpop.f32.mrf.mxu3  ;;  %v790_v2 = vpop.f32.mrf.mxu1  ;;  %v772_v10 = vadd.f32 %v771_v1, %v753_v6  ;;  %v741_v30 = vadd.f32 %v740_v62, %v722_v25 }
  0xce   :  { %v791_v16 = vadd.f32 %v790_v2, %v772_v10  ;;  %v760_v37 = vadd.f32 %v759_v63, %v741_v30  ;;  %v934_v63 = vlaneseq }
  0xd0   :  { %v935_v0 = vand.u32 127, %v934_v63 }
  0xd3   :  { %v809_v7 = vpop.f32.mrf.mxu2  ;;  %v773_v11 = vpop.f32.mrf.mxu0 }
  0xd4   :  { %v828_v8 = vpop.f32.mrf.mxu3  ;;  %v792_v12 = vpop.f32.mrf.mxu1  ;;  %v774_v14 = vadd.f32 %v773_v11, %v755_v9  ;;  %v810_v17 = vadd.f32 %v809_v7, %v791_v16 }
  0xd6   :  { %v793_v18 = vadd.f32 %v792_v12, %v774_v14  ;;  %v829_v27 = vadd.f32 %v828_v8, %v810_v17 }
  0xd8   :  { %v838_v32 = vadd.f32 %v1509_v26, %v829_v27 }
  0xdb   :  { %v811_v19 = vpop.f32.mrf.mxu2  ;;  %v776_v23 = vpop.f32.mrf.mxu0 }
  0xdc   :  { %v830_v20 = vpop.f32.mrf.mxu3  ;;  %v812_v22 = vadd.f32 %v811_v19, %v793_v18  ;;  %v795_v24 = vpop.f32.mrf.mxu1  ;;  %v777_v29 = vadd.f32 %v776_v23, %v758_v21 }
  0xde   :  { %v831_v28 = vadd.f32 %v830_v20, %v812_v22  ;;  %v796_v33 = vadd.f32 %v795_v24, %v777_v29 }
  0xe0   :  { %v839_v31 = vadd.f32 %v1509_v26, %v831_v28 }
  0xe2   :  { %1418 = vmatpush.msk.msra.mxu0 %vm858_vm0, %v839_v31  ;;  %v899_v44 = vrot.slane %v839_v31, 4  ;;  %v882_v60 = vmul.f32 %v839_v31, %v839_v31 }
  0xe3   :  { %v814_v35 = vpop.f32.mrf.mxu2  ;;  %v778_v39 = vpop.f32.mrf.mxu0 }
  0xe4   :  { %v833_v36 = vpop.f32.mrf.mxu3  ;;  %v815_v38 = vadd.f32 %v814_v35, %v796_v33  ;;  %877 = vmatpush.msra.mxu0 %v838_v32  ;;  %v779_v40 = vadd.f32 %v778_v39, %v760_v37  ;;  %v797_v42 = vpop.f32.mrf.mxu1  ;;  %v886_v61 = vsel %vm885_vm2, %v882_v60, 0.0 }
  0xe5   :  { %1419 = vmatmul.msk.f32.vlgmr.msra.gmra.mxu0 %vm854_vm1, %v853_v34 }
  0xe6   :  { %v834_v41 = vadd.f32 %v833_v36, %v815_v38  ;;  %v798_v45 = vadd.f32 %v797_v42, %v779_v40 }
  0xe8   :  { %v840_v43 = vadd.f32 %v1509_v26, %v834_v41 }
  0xea   :  { %v883_v46 = vmul.f32 %v840_v43, %v840_v43  ;;  %v900_v47 = vrot.slane %v840_v43, 4 }
  0xeb   :  { %v816_v48 = vpop.f32.mrf.mxu2 }
  0xec   :  { %v835_v49 = vpop.f32.mrf.mxu3  ;;  %v817_v50 = vadd.f32 %v816_v48, %v798_v45  ;;  %889 = vadd.xlane.f32.xlu1 %v883_v46  ;;  %v901_v51 = vsel %vm858_vm0, %v899_v44, %v900_v47 }
  0xee   :  { %v836_v52 = vadd.f32 %v835_v49, %v817_v50 }
  0xf0   :  { %v841_v53 = vadd.f32 %v1509_v26, %v836_v52 }
  0xf2   :  { %v902_v54 = vrot.slane %v841_v53, 4  ;;  %v884_v55 = vmul.f32 %v841_v53, %v841_v53 }
  0xf4   :  { %891 = vadd.xlane.f32.xlu1 %v884_v55  ;;  %v903_v56 = vsel %vm858_vm0, %v900_v47, %v902_v54 }
 0x15f   :  { %v890_v1 = vpop.xlane.xlu1 %889 }
 0x162   :  { %v879_v57 = vpop.f32.mrf.mxu0 }
 0x163   :  { %922 = vmatpush.xpose.msra.mxu1 %v879_v57  ;;  %1500 = vmatpush.xpose.msra.mxu2 %v879_v57  ;;  %v893_v58 = vmul.f32 %v879_v57, %v879_v57 }
 0x164   :  { %1501 = vmatpush.xpose.msra.mxu3 %v879_v57 }
 0x165   :  { %v894_v59 = vsel %vm858_vm0, %v893_v58, 0.0 }
 0x166   :  { %923 = vmatmul.f32.vlgmr.msra.gmra.mxu1 %v901_v51  ;;  %926 = vmatmul.f32.vlgmr.msra.gmra.mxu2 %v903_v56 }
 0x167   :  { %929 = vmatmul.f32.vlgmr.msra.gmra.mxu3 %v902_v54  ;;  %895 = vadd.xlane.f32.xlu0 %v894_v59  ;;  %v892_v15 = vpop.xlane.xlu1 %891 }
 0x16f   :  { %887 = vadd.xlane.f32.xlu0 %v886_v61 }
 0x1da   :  { %v896_v62 = vpop.xlane.xlu0 %895 }
 0x1db   :  { %v936_v4 = vperm.slane %v896_v62, %v935_v0 }
 0x1dd   :  { %v954_v16 = vadd.f32 %v936_v4, %v890_v1  ;;  %v955_v18 = vadd.f32 %v936_v4, %v892_v15 }
 0x1e2   :  { %v888_v2 = vpop.xlane.xlu0 %887 }
 0x1e3   :  { %v924_v3 = vpop.f32.mrf.mxu1  ;;  %v953_v6 = vadd.f32 %v936_v4, %v888_v2 }
 0x1e4   :  { %v956_v5 = vmul.f32 2.0, %v924_v3 }
 0x1e6   :  { %v962_v7 = vrot.slane %v956_v5, 4 }
 0x1e8   :  { %v970_v8 = vsub.f32 %v953_v6, %v962_v7 }
 0x1e9   :  { %v927_v9 = vpop.f32.mrf.mxu2 }
 0x1ea   :  { %v973_v10 = vmax.f32 %v970_v8, 0.0  ;;  %v957_v11 = vmul.f32 2.0, %v927_v9  ;;  %v930_v12 = vpop.f32.mrf.mxu3 }
 0x1eb   :  { %v958_v13 = vmul.f32 2.0, %v930_v12 }
 0x1ec   :  { %v963_v14 = vrot.slane %v957_v11, 4  ;;  %1510 = vrsqrt.f32 %v973_v10  ;;  %vm983_vm3 = vcmp.eq.f32.partialorder %v973_v10, inf  ;;  %v986_v38 = vand.u32 2147483648, %v973_v10 }
 0x1ed   :  { %v965_v17 = vrot.slane %v958_v13, 4  ;;  %vm985_vm4 = vcmp.eq.f32.partialorder %v973_v10, 0.0 }
 0x1ee   :  { %v964_v19 = vsel %vm858_vm0, %v962_v7, %v963_v14 }
 0x1ef   :  { %v971_v20 = vsub.f32 %v954_v16, %v964_v19  ;;  %v966_v21 = vsel %vm858_vm0, %v963_v14, %v965_v17 }
 0x1f0   :  { %v972_v22 = vsub.f32 %v955_v18, %v966_v21 }
 0x1f1   :  { %v974_v23 = vmax.f32 %v971_v20, 0.0 }
 0x1f2   :  { %v1511_v24 = vpop.eup %1510  ;;  %v975_v25 = vmax.f32 %v972_v22, 0.0 }
 0x1f3   :  { %v977_v26 = vmul.f32 %v1511_v24, %v973_v10  ;;  %1512 = vrsqrt.f32 %v974_v23  ;;  %vm995_vm6 = vcmp.eq.f32.partialorder %v974_v23, inf  ;;  %v998_v51 = vand.u32 2147483648, %v974_v23 }
 0x1f4   :  { %1514 = vrsqrt.f32 %v975_v25  ;;  %vm1007_vm7 = vcmp.eq.f32.partialorder %v975_v25, inf  ;;  %v1010_v52 = vand.u32 2147483648, %v975_v25  ;;  %vm997_vm8 = vcmp.eq.f32.partialorder %v974_v23, 0.0 }
 0x1f5   :  { %v978_v27 = vmul.f32 %v1511_v24, %v977_v26  ;;  %vm1009_vm9 = vcmp.eq.f32.partialorder %v975_v25, 0.0 }
 0x1f7   :  { %v979_v28 = vmul.f32 0.5, %v978_v27 }
 0x1f9   :  { %v1513_v29 = vpop.eup %1512  ;;  %v980_v30 = vsub.f32 1.5, %v979_v28 }
 0x1fa   :  { %v1515_v31 = vpop.eup %1514  ;;  %v989_v32 = vmul.f32 %v1513_v29, %v974_v23 }
 0x1fb   :  { %v981_v33 = vmul.f32 %v1511_v24, %v980_v30  ;;  %v1001_v34 = vmul.f32 %v1515_v31, %v975_v25 }
 0x1fc   :  { %v990_v35 = vmul.f32 %v1513_v29, %v989_v32 }
 0x1fd   :  { %v982_v36 = vmul.f32 %v981_v33, %v973_v10  ;;  %v1002_v37 = vmul.f32 %v1515_v31, %v1001_v34 }
 0x1fe   :  { %v991_v39 = vmul.f32 0.5, %v990_v35 }
 0x1ff   :  { %v984_v40 = vsel %vm983_vm3, %v973_v10, %v982_v36  ;;  %v1003_v41 = vmul.f32 0.5, %v1002_v37 }
 0x200   :  { %v987_v42 = vsel %vm985_vm4, %v986_v38, %v984_v40  ;;  %v992_v43 = vsub.f32 1.5, %v991_v39 }
 0x201   :  { %v1012_v44 = vsub.f32 0.0, %v987_v42  ;;  %v1004_v45 = vsub.f32 1.5, %v1003_v41 }
 0x202   :  { %v993_v46 = vmul.f32 %v1513_v29, %v992_v43 }
 0x203   :  { %v1016_v47 = vsel %vm1015_vm5, %v1012_v44, -inf  ;;  %v1005_v48 = vmul.f32 %v1515_v31, %v1004_v45 }
 0x204   :  { %1017 = vmax.xlane.f32.xlu2 %v1016_v47  ;;  %v994_v49 = vmul.f32 %v993_v46, %v974_v23 }
 0x205   :  { %v1006_v50 = vmul.f32 %v1005_v48, %v975_v25 }
 0x206   :  { %v996_v53 = vsel %vm995_vm6, %v974_v23, %v994_v49 }
 0x207   :  { %v1008_v54 = vsel %vm1007_vm7, %v975_v25, %v1006_v50  ;;  %v999_v55 = vsel %vm997_vm8, %v998_v51, %v996_v53 }
 0x208   :  { %v1011_v56 = vsel %vm1009_vm9, %v1010_v52, %v1008_v54  ;;  %v1013_v57 = vsub.f32 0.0, %v999_v55 }
 0x209   :  { %v1014_v58 = vsub.f32 0.0, %v1011_v56 }
 0x20a   :  { %v1020_v59 = vsel %vm1019_vm10, %v1013_v57, -inf }
 0x20b   :  { %v1023_v60 = vsel %vm1019_vm10, %v1014_v58, -inf }
 0x20c   :  { %1024 = vmax.xlane.f32.xlu0 %v1023_v60  ;;  %1021 = vmax.xlane.f32.xlu2 %v1020_v59 }
 0x277   :  { %v1018_v61 = vpop.xlane.xlu2 %1017 }
 0x278   :  { %v1026_v62 = vsub.f32 %v1012_v44, %v1018_v61 }
 0x27a   :  { %v1029_v63 = vmul.f32 1.442695, %v1026_v62 }
 0x27c   :  { %1516 = vpow2.f32 %v1029_v63 }
 0x27f   :  { %v1025_v0 = vpop.xlane.xlu0 %1024  ;;  %v1022_v1 = vpop.xlane.xlu2 %1021 }
 0x280   :  { %v1028_v2 = vsub.f32 %v1014_v58, %v1025_v0  ;;  %v1027_v3 = vsub.f32 %v1013_v57, %v1022_v1 }
 0x282   :  { %v1517_v4 = vpop.eup %1516  ;;  %v1033_v5 = vmul.f32 1.442695, %v1028_v2  ;;  %v1031_v6 = vmul.f32 1.442695, %v1027_v3 }
 0x283   :  { %v1035_v7 = vsel %vm1015_vm5, %v1517_v4, 0.0 }
 0x284   :  { %1518 = vpow2.f32 %v1033_v5  ;;  %1036 = vadd.xlane.f32.xlu1 %v1035_v7 }
 0x285   :  { %1520 = vpow2.f32 %v1031_v6 }
 0x28a   :  { %v1519_v8 = vpop.eup %1518 }
 0x28b   :  { %v1521_v9 = vpop.eup %1520  ;;  %v1041_v10 = vsel %vm1019_vm10, %v1519_v8, 0.0 }
 0x28c   :  { %1042 = vadd.xlane.f32.xlu0 %v1041_v10  ;;  %v1038_v11 = vsel %vm1019_vm10, %v1521_v9, 0.0 }
 0x28d   :  { %1039 = vadd.xlane.f32.xlu2 %v1038_v11 }
 0x2f7   :  { %v1037_v12 = vpop.xlane.xlu1 %1036 }
 0x2f8   :  { %1522 = vrcp.f32 %v1037_v12  ;;  %v1055_v18 = vand.u32 2147483648, %v1037_v12  ;;  %v1053_v20 = vand.u32 2147483647, %v1037_v12  ;;  %vm1049_vm12 = vweird.f32 %v1037_v12 }
 0x2fa   :  { %v1056_v23 = vor.u32 1.1754944e-38, %v1055_v18  ;;  %vm1054_vm14 = vcmp.eq.f32.partialorder %v1053_v20, 8.507059e+37 }
 0x2fe   :  { %v1523_v13 = vpop.eup %1522 }
 0x2ff   :  { %v1045_v14 = vmul.f32 %v1523_v13, %v1037_v12  ;;  %v1043_v15 = vpop.xlane.xlu0 %1042  ;;  %vm1050_vm11 = vweird.f32 %v1523_v13 }
 0x300   :  { %1524 = vrcp.f32 %v1043_v15  ;;  %v1040_v16 = vpop.xlane.xlu2 %1039  ;;  %vm1051_vm13 = vmor %vm1049_vm12, %vm1050_vm11  ;;  %v1085_v31 = vand.u32 2147483648, %v1043_v15  ;;  %v1083_v34 = vand.u32 2147483647, %v1043_v15  ;;  %vm1079_vm1 = vweird.f32 %v1043_v15 }
 0x301   :  { %v1046_v17 = vsub.f32 1.0, %v1045_v14  ;;  %1526 = vrcp.f32 %v1040_v16  ;;  %v1070_v35 = vand.u32 2147483648, %v1040_v16  ;;  %v1068_v37 = vand.u32 2147483647, %v1040_v16 }
 0x302   :  { %v1086_v39 = vor.u32 1.1754944e-38, %v1085_v31  ;;  %vm1064_vm3 = vweird.f32 %v1040_v16  ;;  %vm1084_vm4 = vcmp.eq.f32.partialorder %v1083_v34, 8.507059e+37 }
 0x303   :  { %v1047_v19 = vmul.f32 %v1523_v13, %v1046_v17  ;;  %v1071_v42 = vor.u32 1.1754944e-38, %v1070_v35 }
 0x305   :  { %v1048_v21 = vadd.f32 %v1523_v13, %v1047_v19 }
 0x306   :  { %v1525_v22 = vpop.eup %1524 }
 0x307   :  { %v1527_v24 = vpop.eup %1526  ;;  %v1052_v25 = vsel %vm1051_vm13, %v1523_v13, %v1048_v21  ;;  %v1075_v26 = vmul.f32 %v1525_v22, %v1043_v15  ;;  %vm1080_vm15 = vweird.f32 %v1525_v22 }
 0x308   :  { %v1057_v27 = vsel %vm1054_vm14, %v1056_v23, %v1052_v25  ;;  %v1060_v28 = vmul.f32 %v1527_v24, %v1040_v16  ;;  %vm1065_vm0 = vweird.f32 %v1527_v24  ;;  %vm1081_vm2 = vmor %vm1079_vm1, %vm1080_vm15 }
 0x309   :  { %v1058_v29 = vmul.f32 %v1517_v4, %v1057_v27  ;;  %v1076_v30 = vsub.f32 1.0, %v1075_v26  ;;  %vm1066_vm6 = vmor %vm1064_vm3, %vm1065_vm0 }
 0x30a   :  { %v1061_v32 = vsub.f32 1.0, %v1060_v28 }
 0x30b   :  { %1089 = vst.msk [vmem:[%s1676_s4 - $0x4] sm:$0xf0] %vm1015_vm5, %v1058_v29  ;;  %v1077_v33 = vmul.f32 %v1525_v22, %v1076_v30  ;;  %vm1069_vm5 = vcmp.eq.f32.partialorder %v1068_v37, 8.507059e+37 }
 0x30c   :  { %v1062_v36 = vmul.f32 %v1527_v24, %v1061_v32 }
 0x30d   :  { %v1078_v38 = vadd.f32 %v1525_v22, %v1077_v33 }
 0x30e   :  { %v1063_v40 = vadd.f32 %v1527_v24, %v1062_v36 }
 0x30f   :  { %v1082_v41 = vsel %vm1081_vm2, %v1525_v22, %v1078_v38 }
 0x310   :  { %v1087_v43 = vsel %vm1084_vm4, %v1086_v39, %v1082_v41  ;;  %v1067_v44 = vsel %vm1066_vm6, %v1527_v24, %v1063_v40 }
 0x311   :  { %v1088_v45 = vmul.f32 %v1519_v8, %v1087_v43  ;;  %v1072_v46 = vsel %vm1069_vm5, %v1071_v42, %v1067_v44 }
 0x312   :  { %v1073_v47 = vmul.f32 %v1521_v9, %v1072_v46 }
 0x313   :  { %1091 = vst.msk [vmem:[%s1676_s4 + $0xc] sm:$0xff] %vm1019_vm10, %v1088_v45 }
 0x314   :  { %1090 = vst.msk [vmem:[%s1676_s4 + $0x4] sm:$0xff] %vm1019_vm10, %v1073_v47 }
 0x315   :  { %1096 = vsyncpa [#allocation4], 1 }
 0x316   :  { %1097 = vsyncpa [#allocation6], 1 }

</bundles_post_ra>
